<compile_context>
chip_gen: v7x
topology: tpu7x:2x2x1
jax: 0.10.0
libtpu: 0.0.40
codegen_flags: <defaults>
</compile_context>

<pallas_src>
import functools
import math

import numpy as np
import jax
import jax.numpy as jnp
from jax.experimental import pallas as pl
from jax.experimental.pallas import tpu as pltpu


# ---------------------------------------------------------------------------
# Deterministic, in-script Padé coefficient computation (replaces mpmath).
# ---------------------------------------------------------------------------
def _arccos_taylor_coeffs(order_sum):
    """Taylor coefficients of acos(x) around 0 up to degree `order_sum`."""
    c = [0.0] * (order_sum + 1)
    c[0] = float(np.pi / 2.0)
    n = 0
    while 2 * n + 1 <= order_sum:
        coef = math.factorial(2 * n) / (4 ** n * math.factorial(n) ** 2 * (2 * n + 1))
        c[2 * n + 1] = -coef  # acos(x) = pi/2 - arcsin(x)
        n += 1
    return c


def compute_pade_coefficients(order=(4, 4)):
    """Padé [m/n] coefficients for arccos (numerator p, denominator q, q[0]=1)."""
    m, n = order
    c = np.asarray(_arccos_taylor_coeffs(m + n), dtype=np.float64)
    # Denominator tail: sum_{j=0..n} q[j] * c[m+k-j] = 0 for k = 1..n, q[0] = 1.
    A = np.zeros((n, n), dtype=np.float64)
    b = np.zeros((n,), dtype=np.float64)
    for k in range(1, n + 1):
        b[k - 1] = -c[m + k]
        for j in range(1, n + 1):
            idx = m + k - j
            A[k - 1, j - 1] = c[idx] if idx >= 0 else 0.0
    q_tail = np.linalg.solve(A, b)
    q = np.concatenate([[1.0], q_tail])
    # Numerator: p[i] = sum_{j=0..min(i,n)} q[j] * c[i-j].
    p = np.zeros((m + 1,), dtype=np.float64)
    for i in range(m + 1):
        p[i] = sum(q[j] * c[i - j] for j in range(0, min(i, n) + 1))
    return [float(v) for v in p], [float(v) for v in q]


# ---------------------------------------------------------------------------
# Pallas kernel: clamp + Horner(p) / Horner(q), pure VPU (+ EUP for bf16) work.
# ---------------------------------------------------------------------------
def _pade_arccos_kernel(x_ref, o_ref, *, p_coeffs, q_coeffs, exact_divide):
    # Compute in f32 regardless of I/O dtype (v5e VPU has no bf16 path; the
    # cast is a no-op for f32 inputs).
    x = x_ref[...].astype(jnp.float32)
    x = jnp.clip(x, -1.0 + 1e-6, 1.0 - 1e-6)

    # Horner seeded with the leading coefficient (saves one FMA per poly).
    num = jnp.full_like(x, p_coeffs[-1])
    for coef in reversed(p_coeffs[:-1]):
        num = num * x + coef

    den = jnp.full_like(x, q_coeffs[-1])
    for coef in reversed(q_coeffs[:-1]):
        den = den * x + coef

    if exact_divide:
        # >= 32-bit outputs: exact divide, bit-faithful to the reference.
        res = num / den
    else:
        # bf16/fp16 outputs: EUP approx reciprocal (separate issue slot,
        # already exceeds the output precision — no Newton step needed).
        res = num * pl.reciprocal(den, approx=True)

    o_ref[...] = res.astype(o_ref.dtype)


# ---------------------------------------------------------------------------
# Wrapper: lane-dense 2-D layout, chip-aware block sizing, ragged last block.
# ---------------------------------------------------------------------------
def _round_up(a, b):
    return -(-a // b) * b


def _sublane_multiple(dtype):
    itemsize = jnp.dtype(dtype).itemsize
    return max(8, 32 // itemsize)  # 8 for f32, 16 for bf16, 32 for int8/fp8


def _chip_info():
    """(has_two_tensorcores, is_v7x) with safe fallbacks."""
    kind = ""
    try:
        kind = jax.devices()[0].device_kind.lower()
    except Exception:
        pass
    is_v7 = "v7" in kind
    two_tc = is_v7 or ("v4" in kind) or ("v5p" in kind)
    return two_tc, is_v7


def pade_arccos(x, p_coeffs, q_coeffs, *, lane_cols=512):
    """Apply the Padé-arccos approximation elementwise to an array of any shape."""
    orig_shape = x.shape
    out_dtype = x.dtype
    n = int(np.prod(orig_shape)) if orig_shape else 1
    if n == 0:
        return x

    itemsize = jnp.dtype(out_dtype).itemsize
    sub = _sublane_multiple(out_dtype)
    two_tc, is_v7 = _chip_info()

    # Block budget: ~4 MiB tiles on v7x (64 MiB VMEM), ~8 MiB on 128 MiB chips.
    target_block_bytes = (4 if is_v7 else 8) * 1024 * 1024

    # ---- Lane-dense 2-D layout selection (fast paths avoid pad + slice). ----
    padded = False
    if (len(orig_shape) >= 2
            and orig_shape[-1] % 128 == 0
            and orig_shape[-1] * sub * itemsize <= target_block_bytes):
        cols = int(orig_shape[-1])
        rows = n // cols
        x2d = x.reshape(rows, cols)
    else:
        cols = None
        for c in (lane_cols, 256, 128):
            if n % c == 0:
                cols = c
                break
        if cols is not None:
            rows = n // cols
            x2d = x.reshape(rows, cols)
        else:
            # Unaligned: single small pad (< lane_cols elements), then reshape.
            cols = lane_cols
            rows = pl.cdiv(n, cols)
            pad = rows * cols - n
            x2d = jnp.pad(x.reshape(-1), (0, pad)).reshape(rows, cols)
            padded = True

    # ---- Block sizing (grid handles a ragged last block; no row round-up). --
    row_cap = max(sub, (target_block_bytes // (cols * itemsize)) // sub * sub)
    if rows <= row_cap:
        if two_tc and rows >= 2 * sub:
            # Split so both TensorCores get work (2-TC chips only).
            block_rows = _round_up(pl.cdiv(rows, 2), sub)
        else:
            block_rows = rows  # single full-extent block (always legal)
    else:
        block_rows = row_cap
    num_blocks = pl.cdiv(rows, block_rows)

    block_bytes = block_rows * cols * itemsize
    vmem_cap = (48 if is_v7 else 100) * 1024 * 1024
    vmem_limit = int(min(vmem_cap,
                         max(32 * 1024 * 1024, 4 * block_bytes + 8 * 1024 * 1024)))

    exact_divide = itemsize >= 4
    kernel = functools.partial(
        _pade_arccos_kernel,
        p_coeffs=tuple(float(c) for c in p_coeffs),
        q_coeffs=tuple(float(c) for c in q_coeffs),
        exact_divide=exact_divide,
    )

    # ~2 flops per Horner step (x2 polys) + clamp + divide.
    flops_per_elem = 2 * (len(p_coeffs) + len(q_coeffs)) + 4
    cost = pl.CostEstimate(
        flops=flops_per_elem * rows * cols,
        transcendentals=0 if exact_divide else rows * cols,
        bytes_accessed=2 * rows * cols * itemsize,
    )

    out2d = pl.pallas_call(
        kernel,
        out_shape=jax.ShapeDtypeStruct((rows, cols), out_dtype),
        grid_spec=pl.GridSpec(
            grid=(num_blocks,),
            in_specs=[pl.BlockSpec((block_rows, cols), lambda i: (i, 0))],
            out_specs=pl.BlockSpec((block_rows, cols), lambda i: (i, 0)),
        ),
        compiler_params=pltpu.CompilerParams(
            dimension_semantics=("parallel",),
            vmem_limit_bytes=vmem_limit,
        ),
        cost_estimate=cost,
    )(x2d)

    if padded:
        return out2d.reshape(-1)[:n].reshape(orig_shape)
    return out2d.reshape(orig_shape)


# ---------------------------------------------------------------------------
# Pure-JAX reference (mirrors the PyTorch forward exactly, exact divide).
# ---------------------------------------------------------------------------
def pade_arccos_ref(x, p_coeffs, q_coeffs):
    x = jnp.clip(x.astype(jnp.float32), -1.0 + 1e-6, 1.0 - 1e-6)
    num = jnp.zeros_like(x)
    for coef in reversed(p_coeffs):
        num = num * x + coef
    den = jnp.zeros_like(x)
    for coef in reversed(q_coeffs):
        den = den * x + coef
    return num / den


if __name__ == "__main__":
    # Deterministic "module init": Padé [4/4] coefficients for arccos.
    p_coeffs, q_coeffs = compute_pade_coefficients(order=(4, 4))

    key = jax.random.PRNGKey(0)
    k1, k2, k3 = jax.random.split(key, 3)

    # (1) Unaligned f32 cosine-similarity rows (exercises flatten/pad path),
    #     values slightly outside [-1, 1] to exercise the clamp.
    x = jax.random.uniform(k1, (16, 200), minval=-1.2, maxval=1.2, dtype=jnp.float32)
    out = jax.block_until_ready(pade_arccos(x, p_coeffs, q_coeffs))
    ref = pade_arccos_ref(x, p_coeffs, q_coeffs)
    np.testing.assert_allclose(np.asarray(out), np.asarray(ref), rtol=1e-5, atol=1e-5)
    mask = np.abs(np.asarray(x)) < 0.5
    np.testing.assert_allclose(
        np.asarray(out)[mask], np.arccos(np.asarray(x)[mask]), atol=5e-3
    )

    # (2) Lane-aligned f32 shape (fast path: no pad, no trailing slice).
    xa = jax.random.uniform(k2, (8, 256), minval=-0.99, maxval=0.99, dtype=jnp.float32)
    outa = jax.block_until_ready(pade_arccos(xa, p_coeffs, q_coeffs))
    refa = pade_arccos_ref(xa, p_coeffs, q_coeffs)
    np.testing.assert_allclose(np.asarray(outa), np.asarray(refa), rtol=1e-5, atol=1e-5)

    # (3) bf16 I/O (fast path, EUP approx reciprocal instead of exact divide).
    xb = jax.random.uniform(k3, (16, 256), minval=-0.99, maxval=0.99).astype(jnp.bfloat16)
    outb = jax.block_until_ready(pade_arccos(xb, p_coeffs, q_coeffs))
    refb = pade_arccos_ref(xb.astype(jnp.float32), p_coeffs, q_coeffs)
    np.testing.assert_allclose(
        np.asarray(outb.astype(jnp.float32)), np.asarray(refb), rtol=5e-2, atol=5e-2
    )

    print("KERNEL_OK")
</pallas_src>

<mosaic_0001>
module attributes {stable_mosaic.version = 11 : i64} {
  func.func @_pade_arccos_kernel(%arg0: i32, %arg1: memref<25x128xf32, #tpu.memory_space<vmem>>, %arg2: memref<25x128xf32, #tpu.memory_space<vmem>>) attributes {dimension_semantics = [#tpu.dimension_semantics<parallel>], iteration_bounds = array<i64: 1>, scalar_prefetch = 0 : i64, scratch_operands = 0 : i64, tpu.core_type = #tpu.core_type<tc>, window_params = [{transform_indices = @transform_0, window_bounds = array<i64: 25, 128>}, {transform_indices = @transform_1, window_bounds = array<i64: 25, 128>}]} {
    %c0 = arith.constant 0 : index
    %c0_0 = arith.constant 0 : index
    %0 = vector.load %arg1[%c0, %c0_0] : memref<25x128xf32, #tpu.memory_space<vmem>>, vector<25x128xf32>
    %cst = arith.constant -0.999998986 : f32
    %cst_1 = arith.constant 0.999998986 : f32
    %1 = vector.broadcast %cst : f32 to vector<25x128xf32>
    %2 = arith.maximumf %1, %0 : vector<25x128xf32>
    %3 = vector.broadcast %cst_1 : f32 to vector<25x128xf32>
    %4 = arith.minimumf %3, %2 : vector<25x128xf32>
    %cst_2 = arith.constant 0.0603898577 : f32
    %5 = vector.broadcast %cst_2 : f32 to vector<25x128xf32>
    %6 = arith.mulf %5, %4 : vector<25x128xf32>
    %cst_3 = arith.constant 0.514005601 : f32
    %7 = vector.broadcast %cst_3 : f32 to vector<25x128xf32>
    %8 = arith.addf %6, %7 : vector<25x128xf32>
    %9 = arith.mulf %8, %4 : vector<25x128xf32>
    %cst_4 = arith.constant -1.06919754 : f32
    %10 = vector.broadcast %cst_4 : f32 to vector<25x128xf32>
    %11 = arith.addf %9, %10 : vector<25x128xf32>
    %12 = arith.mulf %11, %4 : vector<25x128xf32>
    %cst_5 = arith.constant -1.000000e+00 : f32
    %13 = vector.broadcast %cst_5 : f32 to vector<25x128xf32>
    %14 = arith.addf %12, %13 : vector<25x128xf32>
    %15 = arith.mulf %14, %4 : vector<25x128xf32>
    %cst_6 = arith.constant 1.57079637 : f32
    %16 = vector.broadcast %cst_6 : f32 to vector<25x128xf32>
    %17 = arith.addf %15, %16 : vector<25x128xf32>
    %cst_7 = arith.constant 0.0384453796 : f32
    %18 = vector.broadcast %cst_7 : f32 to vector<25x128xf32>
    %19 = arith.mulf %18, %4 : vector<25x128xf32>
    %cst_8 = arith.constant 0.000000e+00 : f32
    %20 = vector.broadcast %cst_8 : f32 to vector<25x128xf32>
    %21 = arith.addf %19, %20 : vector<25x128xf32>
    %22 = arith.mulf %21, %4 : vector<25x128xf32>
    %cst_9 = arith.constant -0.680672288 : f32
    %23 = vector.broadcast %cst_9 : f32 to vector<25x128xf32>
    %24 = arith.addf %22, %23 : vector<25x128xf32>
    %25 = arith.mulf %24, %4 : vector<25x128xf32>
    %cst_10 = arith.constant -0.000000e+00 : f32
    %26 = vector.broadcast %cst_10 : f32 to vector<25x128xf32>
    %27 = arith.addf %25, %26 : vector<25x128xf32>
    %28 = arith.mulf %27, %4 : vector<25x128xf32>
    %cst_11 = arith.constant 1.000000e+00 : f32
    %29 = vector.broadcast %cst_11 : f32 to vector<25x128xf32>
    %30 = arith.addf %28, %29 : vector<25x128xf32>
    %31 = arith.divf %17, %30 : vector<25x128xf32>
    %c0_12 = arith.constant 0 : index
    %c0_13 = arith.constant 0 : index
    %32 = vector.load %arg2[%c0_12, %c0_13] : memref<25x128xf32, #tpu.memory_space<vmem>>, vector<25x128xf32>
    tpu.vector_store %arg2[%c0_12, %c0_13], %31 {strides = array<i32>} : memref<25x128xf32, #tpu.memory_space<vmem>>, vector<25x128xf32>,
    return
  }
  func.func @transform_0(%arg0: i32) -> (i32, i32) {
    %c0_i32 = arith.constant 0 : i32
    %c0_i32_0 = arith.constant 0 : i32
    return %arg0, %c0_i32 : i32, i32
  }
  func.func @transform_1(%arg0: i32) -> (i32, i32) {
    %c0_i32 = arith.constant 0 : i32
    %c0_i32_0 = arith.constant 0 : i32
    return %arg0, %c0_i32 : i32, i32
  }
}

</mosaic_0001>

<bundles_post_ra>
// kernel: tpu_custom_call.1
= control target key start
LH: loop header
LB: loop body
LE: loop exit
PB: predicated region body
PF: predicated region fallthrough
CT: control target
= control target key end

     0   :  { %6 = vsyncpa [#allocation3], 0  ;;  %s232_s0 = inlined_call_operand.hbm [shape: f32[25,128], index: 0, kind: input, shape index: {}]   ;;  %s233_s1 = inlined_call_operand.hbm [shape: f32[25,128], index: 1, kind: output, shape index: {}]  }
   0x1   :  { %7 = vsyncpa [#allocation4], 0  ;;  %s188_s6 = smov [#allocation2]   ;;  %s140_s10 = scalar_lea.hbm %s232_s0, 512 }
   0x2   :  { %s13_s7 = sshll.u32 %s188_s6, 4  ;;  %p141_p0 = scmp.ne.s32.totalorder %s232_s0, %s140_s10  ;;  %s14_s7 = int_to_ptr.vmem [resolvable:$true] %s13_s7 }
   0x3   :  { %p144_p1 = scmp.lt.u32.totalorder %s140_s10, %s232_s0 }
   0x5   :  { %p146_p2 = pnand %p144_p1, %p141_p0 }
   0x7   :  { %149 = shalt.err (!%p146_p2)
}
   0x8   :  { %s150_s15 = scalar_lea.vmem %s14_s7, 512  ;;  %p155_p4 = scmp.lt.s32.totalorder %s14_s7, %s14_s7 }
   0x9   :  { %p151_p3 = scmp.ne.s32.totalorder %s14_s7, %s150_s15  ;;  %p156_p5 = scmp.lt.s32.totalorder %s150_s15, %s150_s15 }
   0xb   :  { %p157_p6 = por %p156_p5, %p155_p4 }
   0xd   :  { %p158_p7 = pnand %p157_p6, %p151_p3 }
   0xf   :  { %161 = shalt.err (!%p158_p7)
}
  0x10   :  { %s189_s16 = smov 128   ;;  %s190_s17 = smov 8  }
  0x11   :  { %19 = dma.hbm_to_vmem [thread:$0]  %s232_s0, 512, %s14_s7, [#allocation3], %s189_s16, %s189_s16, %s190_s17  }
  0x12   :  { %184 = dma.done.wait [#allocation3], 512  }
  0x13   :  { %185 = vsyncadd [#allocation3], 4294966784  ;;  %v23_v0 = vld [vmem:[#allocation2] sm:$0xff]  ;;  %v24_v1 = vld [vmem:[#allocation2 + $0x8] sm:$0xff]  ;;  %s191_s0 = smov [#allocation5]  }
  0x14   :  { %v25_v2 = vld [vmem:[#allocation2 + $0x10] sm:$0xff]  ;;  %v124_v3 = vclamps-f32 %v23_v0, 0.999999  ;;  %v125_v4 = vclamps-f32 %v24_v1, 0.999999  ;;  %s112_s20 = sshll.u32 %s191_s0, 4  ;;  %s113_s20 = int_to_ptr.vmem [resolvable:$true] %s112_s20 }
  0x15   :  { %v126_v5 = vclamps-f32 %v25_v2, 0.999999  ;;  %v26_v6 = vld [vmem:[#allocation2 + $0x18] sm:$0x1]  ;;  %s162_s21 = scalar_lea.vmem %s113_s20, 512  ;;  %p167_p9 = scmp.lt.s32.totalorder %s113_s20, %s113_s20 }
  0x16   :  { %v35_v7 = vmul.f32 0.060389858, %v124_v3  ;;  %v67_v8 = vmul.f32 0.03844538, %v124_v3  ;;  %v36_v9 = vmul.f32 0.060389858, %v125_v4  ;;  %p163_p8 = scmp.ne.s32.totalorder %s113_s20, %s162_s21  ;;  %p168_p10 = scmp.lt.s32.totalorder %s162_s21, %s162_s21 }
  0x17   :  { %v68_v10 = vmul.f32 0.03844538, %v125_v4  ;;  %v37_v11 = vmul.f32 0.060389858, %v126_v5  ;;  %v69_v12 = vmul.f32 0.03844538, %v126_v5 }
  0x18   :  { %v39_v13 = vadd.f32 0.5140056, %v35_v7  ;;  %v75_v14 = vmul.f32 %v124_v3, %v67_v8  ;;  %v40_v15 = vadd.f32 0.5140056, %v36_v9  ;;  %v127_v16 = vclamps-f32 %v26_v6, 0.999999  ;;  %p169_p11 = por %p168_p10, %p167_p9 }
  0x19   :  { %v76_v17 = vmul.f32 %v125_v4, %v68_v10  ;;  %v41_v18 = vadd.f32 0.5140056, %v37_v11  ;;  %v77_v19 = vmul.f32 %v126_v5, %v69_v12 }
  0x1a   :  { %v43_v20 = vmul.f32 %v124_v3, %v39_v13  ;;  %v79_v21 = vadd.f32 -0.6806723, %v75_v14  ;;  %v44_v22 = vmul.f32 %v125_v4, %v40_v15  ;;  %v38_v23 = vmul.f32 0.060389858, %v127_v16  ;;  %p170_p12 = pnand %p169_p11, %p163_p8 }
  0x1b   :  { %v80_v24 = vadd.f32 -0.6806723, %v76_v17  ;;  %v45_v25 = vmul.f32 %v126_v5, %v41_v18  ;;  %v81_v26 = vadd.f32 -0.6806723, %v77_v19  ;;  %v70_v27 = vmul.f32 0.03844538, %v127_v16 }
  0x1c   :  { %v47_v28 = vadd.f32 -1.0691975, %v43_v20  ;;  %v83_v29 = vmul.f32 %v124_v3, %v79_v21  ;;  %v48_v30 = vadd.f32 -1.0691975, %v44_v22  ;;  %v42_v31 = vadd.f32 0.5140056, %v38_v23 }
  0x1d   :  { %v84_v32 = vmul.f32 %v125_v4, %v80_v24  ;;  %v49_v33 = vadd.f32 -1.0691975, %v45_v25  ;;  %v85_v34 = vmul.f32 %v126_v5, %v81_v26  ;;  %v78_v35 = vmul.f32 %v127_v16, %v70_v27 }
  0x1e   :  { %v51_v36 = vmul.f32 %v124_v3, %v47_v28  ;;  %v87_v37 = vmul.f32 %v124_v3, %v83_v29  ;;  %v52_v38 = vmul.f32 %v125_v4, %v48_v30  ;;  %v46_v39 = vmul.f32 %v127_v16, %v42_v31 }
  0x1f   :  { %v88_v40 = vmul.f32 %v125_v4, %v84_v32  ;;  %v53_v41 = vmul.f32 %v126_v5, %v49_v33  ;;  %v89_v42 = vmul.f32 %v126_v5, %v85_v34  ;;  %v82_v43 = vadd.f32 -0.6806723, %v78_v35 }
  0x20   :  { %v91_v44 = vadd.f32 1.0, %v87_v37  ;;  %v50_v45 = vadd.f32 -1.0691975, %v46_v39  ;;  %v55_v46 = vadd.f32 -1.0, %v51_v36  ;;  %v56_v50 = vadd.f32 -1.0, %v52_v38 }
  0x21   :  { %v92_v47 = vadd.f32 1.0, %v88_v40  ;;  %v93_v48 = vadd.f32 1.0, %v89_v42  ;;  %v86_v49 = vmul.f32 %v127_v16, %v82_v43  ;;  %v57_v52 = vadd.f32 -1.0, %v53_v41 }
  0x22   :  { %132 = vrcp.f32 %v91_v44  ;;  %v54_v51 = vmul.f32 %v127_v16, %v50_v45  ;;  %v59_v54 = vmul.f32 %v124_v3, %v55_v46  ;;  %v60_v56 = vmul.f32 %v125_v4, %v56_v50 }
  0x23   :  { %134 = vrcp.f32 %v92_v47  ;;  %v90_v53 = vmul.f32 %v127_v16, %v86_v49  ;;  %v61_v58 = vmul.f32 %v126_v5, %v57_v52 }
  0x24   :  { %136 = vrcp.f32 %v93_v48  ;;  %v58_v57 = vadd.f32 -1.0, %v54_v51  ;;  %v63_v59 = vadd.f32 1.5707964, %v59_v54  ;;  %v64_v60 = vadd.f32 1.5707964, %v60_v56 }
  0x25   :  { %v94_v55 = vadd.f32 1.0, %v90_v53  ;;  %v65_v62 = vadd.f32 1.5707964, %v61_v58 }
  0x26   :  { %v62_v61 = vmul.f32 %v127_v16, %v58_v57 }
  0x27   :  { %138 = vrcp.f32 %v94_v55 }
  0x28   :  { %v66_v7 = vadd.f32 1.5707964, %v62_v61 }
  0x2c   :  { %v133_v63 = vpop.eup %132 }
  0x2d   :  { %v135_v0 = vpop.eup %134  ;;  %v96_v1 = vmul.f32 %v133_v63, %v63_v59 }
  0x2e   :  { %v137_v2 = vpop.eup %136  ;;  %v98_v6 = vmul.f32 %v135_v0, %v64_v60 }
  0x2f   :  { %103 = vst [vmem:[#allocation5] sm:$0xff] %v96_v1  ;;  %v100_v8 = vmul.f32 %v137_v2, %v65_v62 }
  0x30   :  { %104 = vst [vmem:[#allocation5 + $0x8] sm:$0xff] %v98_v6 }
  0x31   :  { %v139_v3 = vpop.eup %138  ;;  %105 = vst [vmem:[#allocation5 + $0x10] sm:$0xff] %v100_v8 }
  0x32   :  { %v102_v4 = vmul.f32 %v139_v3, %v66_v7 }
  0x34   :  { %106 = vst [vmem:[#allocation5 + $0x18] sm:$0x1] %v102_v4 }
  0x35   :  { %173 = shalt.err (!%p170_p12)
}
  0x36   :  { %s174_s24 = scalar_lea.hbm %s233_s1, 512 }
  0x37   :  { %p175_p13 = scmp.ne.s32.totalorder %s233_s1, %s174_s24  ;;  %p178_p0 = scmp.lt.u32.totalorder %s174_s24, %s233_s1 }
  0x39   :  { %p180_p1 = pnand %p178_p0, %p175_p13 }
  0x3b   :  { %183 = shalt.err (!%p180_p1)
}
  0x3c   :  { %118 = dma.vmem_to_hbm [thread:$0]  %s113_s20, 512, %s233_s1, [#allocation4], %s189_s16, %s189_s16, %s190_s17  }
  0x3d   :  { %186 = dma.done.wait [#allocation4], 512  }
  0x3e   :  { %187 = vsyncadd [#allocation4], 4294966784 }
  0x3f   :  { %122 = vsyncpa [#allocation3], 1 }
  0x40   :  { %123 = vsyncpa [#allocation4], 1 }

</bundles_post_ra>
